<compile_context>
chip_gen: v5e
topology: v5e:2x2
jax: 0.10.0
libtpu: 0.0.40
codegen_flags: <defaults>
</compile_context>

<pallas_src>
import functools

import jax
import jax.numpy as jnp
from jax import lax
from jax.experimental import pallas as pl
from jax.experimental.pallas import tpu as pltpu


def _trajscore_kernel(fs_ref, ft_ref, fp_ref, w1s_ref, w1t_ref, w1p_ref,
                      b1_ref, w2_ref, b2_ref, o_ref):
    # fs_ref : (bb, feat_dim)        batch tile of f_s
    # ft_ref : (bb, traj_feat_dim)   batch tile of f_tau
    # fp_ref : (bb, cp_feat_dim)     batch tile of f_p
    # w1*_ref: row-blocks of mlp1 weight, pre-transposed to (in_slice, F)
    # b1_ref : (1, F)    mlp1 bias
    # w2_ref : (1, F)    mlp2 weight as a row
    # b2_ref : (1,)      mlp2 bias, SMEM scalar (f32)
    # o_ref  : (1, bb)   lane-dense logits row for this batch tile
    #
    # Fused "concat": three partial matmuls against the matching w1 row-blocks,
    # all accumulated in f32 on the MXU.
    h = jnp.dot(fs_ref[...], w1s_ref[...], preferred_element_type=jnp.float32)
    h = h + jnp.dot(ft_ref[...], w1t_ref[...], preferred_element_type=jnp.float32)
    h = h + jnp.dot(fp_ref[...], w1p_ref[...], preferred_element_type=jnp.float32)
    h = h + b1_ref[...].astype(jnp.float32)

    # Leaky ReLU (PyTorch default slope 0.01), in f32 on the VPU.
    h = jnp.where(h > 0, h, 0.01 * h)

    # mlp2: contract the F axis of (1, F) with the F axis of (bb, F) -> (1, bb).
    # This keeps the batch dimension on lanes so the store is a full-width vst.
    w2 = w2_ref[...].astype(jnp.float32)
    out = lax.dot_general(
        w2, h,
        dimension_numbers=(((1,), (1,)), ((), ())),
        preferred_element_type=jnp.float32,
    )
    out = out + b2_ref[0]
    o_ref[...] = out.astype(o_ref.dtype)


@functools.partial(jax.jit, static_argnames=("block_b",))
def trajscore_forward(f_p, f_s, f_tau, w1, b1, w2, b2, *, block_b=1024):
    """Pallas implementation of TrajScore.forward.

    f_p  : (B, cp_feat_dim)
    f_s  : (B, feat_dim)
    f_tau: (B, traj_feat_dim)
    w1   : (feat_dim + traj_feat_dim + cp_feat_dim, feat_dim)  (pre-transposed)
    b1   : (feat_dim,) or (1, feat_dim)
    w2   : (feat_dim, 1) or (feat_dim,)                        (pre-transposed)
    b2   : scalar / (1,) / (1, 1)
    returns logits of shape (B, 1)
    """
    B, feat_dim = f_s.shape
    traj_dim = f_tau.shape[1]
    cp_dim = f_p.shape[1]
    d_in = feat_dim + traj_dim + cp_dim
    F = w1.shape[1]
    dtype = f_s.dtype

    # Split mlp1's weight so torch.cat([f_s, f_tau, f_p], -1) never materializes.
    w1_s = w1[:feat_dim]
    w1_t = w1[feat_dim:feat_dim + traj_dim]
    w1_p = w1[feat_dim + traj_dim:]
    b1_row = jnp.reshape(b1, (1, F))
    w2_row = jnp.reshape(w2, (1, F))
    b2_smem = jnp.reshape(jnp.asarray(b2), (1,)).astype(jnp.float32)

    # Batch tile: as large as possible (per-grid-step overhead ~0.35 us), but the
    # whole batch if it is smaller than one tile. When tiling, keep a multiple of
    # 128 so the lane-dense output blocks stay aligned (it is also a multiple of 8
    # for the input sublane dims). Pallas masks the ragged last block, so B does
    # not need to divide evenly.
    # TODO(synk): for v7x, callers with moderate B should pick block_b <= B // 2 so
    # the "parallel" batch axis has >= 2 steps and both TensorCores are used.
    if B <= block_b:
        bb = B
    else:
        bb = max(128, (block_b // 128) * 128)
    nb = pl.cdiv(B, bb)

    grid_spec = pltpu.PrefetchScalarGridSpec(
        num_scalar_prefetch=0,
        grid=(nb,),
        in_specs=[
            pl.BlockSpec((bb, feat_dim), lambda i: (i, 0)),   # f_s tile
            pl.BlockSpec((bb, traj_dim), lambda i: (i, 0)),   # f_tau tile
            pl.BlockSpec((bb, cp_dim), lambda i: (i, 0)),     # f_p tile
            pl.BlockSpec((feat_dim, F), lambda i: (0, 0)),    # w1[:feat]
            pl.BlockSpec((traj_dim, F), lambda i: (0, 0)),    # w1[feat:feat+traj]
            pl.BlockSpec((cp_dim, F), lambda i: (0, 0)),      # w1[feat+traj:]
            pl.BlockSpec((1, F), lambda i: (0, 0)),           # b1
            pl.BlockSpec((1, F), lambda i: (0, 0)),           # w2 row
            pl.BlockSpec(memory_space=pltpu.MemorySpace.SMEM),  # b2 scalar
        ],
        # Lane-dense output: one (1, bb) row of logits per batch tile.
        out_specs=pl.BlockSpec((1, bb), lambda i: (0, i)),
    )

    itemsize = jnp.dtype(dtype).itemsize
    flops = 2 * B * d_in * F + 2 * B * F
    bytes_accessed = (B * d_in + d_in * F + 2 * F + 1) * itemsize + B * itemsize

    out_row = pl.pallas_call(
        _trajscore_kernel,
        out_shape=jax.ShapeDtypeStruct((1, B), dtype),
        grid_spec=grid_spec,
        compiler_params=pltpu.CompilerParams(
            dimension_semantics=("parallel",),
        ),
        cost_estimate=pl.CostEstimate(
            flops=flops, transcendentals=0, bytes_accessed=bytes_accessed
        ),
    )(f_s, f_tau, f_p, w1_s, w1_t, w1_p, b1_row, w2_row, b2_smem)

    return out_row.reshape(B, 1)


def init_params(key, feat_dim, traj_feat_dim, cp_feat_dim, dtype=jnp.float32):
    """Deterministic synthetic init matching nn.Linear shapes (stored as (in, out))."""
    d_in = feat_dim + traj_feat_dim + cp_feat_dim
    k1, k2, k3, k4 = jax.random.split(key, 4)
    bound1 = 1.0 / jnp.sqrt(d_in)
    bound2 = 1.0 / jnp.sqrt(feat_dim)
    w1 = jax.random.uniform(k1, (d_in, feat_dim), dtype, -bound1, bound1)
    b1 = jax.random.uniform(k2, (feat_dim,), dtype, -bound1, bound1)
    w2 = jax.random.uniform(k3, (feat_dim, 1), dtype, -bound2, bound2)
    b2 = jax.random.uniform(k4, (1,), dtype, -bound2, bound2)
    return w1, b1, w2, b2


def _reference_forward(f_p, f_s, f_tau, w1, b1, w2, b2):
    x = jnp.concatenate([f_s, f_tau, f_p], axis=-1).astype(jnp.float32)
    h = x @ w1.astype(jnp.float32) + jnp.reshape(b1, (1, -1)).astype(jnp.float32)
    h = jnp.where(h > 0, h, 0.01 * h)
    out = h @ jnp.reshape(w2, (-1, 1)).astype(jnp.float32)
    return out + jnp.reshape(b2, (1, 1)).astype(jnp.float32)


if __name__ == "__main__":
    # Small shapes consistent with the module: args.feat_dim=32,
    # args.traj_feat_dim=16, args.cp_feat_dim=16, batch=8.
    feat_dim, traj_feat_dim, cp_feat_dim = 32, 16, 16
    B = 8

    key = jax.random.PRNGKey(0)
    kp, ks, kt, kw = jax.random.split(key, 4)
    f_p = jax.random.normal(kp, (B, cp_feat_dim), jnp.float32)
    f_s = jax.random.normal(ks, (B, feat_dim), jnp.float32)
    f_tau = jax.random.normal(kt, (B, traj_feat_dim), jnp.float32)
    w1, b1, w2, b2 = init_params(kw, feat_dim, traj_feat_dim, cp_feat_dim)

    ref = _reference_forward(f_p, f_s, f_tau, w1, b1, w2, b2)

    # f32 path. Tolerance allows for possible MXU pass-precision differences
    # between the fused kernel and the XLA reference matmuls.
    out = trajscore_forward(f_p, f_s, f_tau, w1, b1, w2, b2)
    out = jax.block_until_ready(out)
    assert out.shape == (B, 1)
    assert jnp.allclose(out, ref, atol=1e-2, rtol=1e-2), "f32 mismatch vs reference"

    # bf16 path (recommended production dtype: halves HBM traffic; f32 accumulation
    # is preserved inside the kernel). Loose check against the f32 reference.
    bf16 = lambda t: t.astype(jnp.bfloat16)
    out_bf16 = trajscore_forward(
        bf16(f_p), bf16(f_s), bf16(f_tau), bf16(w1), bf16(b1), bf16(w2), bf16(b2)
    )
    out_bf16 = jax.block_until_ready(out_bf16)
    assert out_bf16.shape == (B, 1)
    assert jnp.allclose(out_bf16.astype(jnp.float32), ref, atol=1.5e-1, rtol=1.5e-1), (
        "bf16 mismatch vs reference"
    )

    print("KERNEL_OK")
</pallas_src>

<mosaic_0001>
module attributes {stable_mosaic.version = 11 : i64} {
  func.func @_trajscore_kernel(%arg0: i32, %arg1: memref<8x32xf32, #tpu.memory_space<vmem>>, %arg2: memref<8x16xf32, #tpu.memory_space<vmem>>, %arg3: memref<8x16xf32, #tpu.memory_space<vmem>>, %arg4: memref<32x32xf32, #tpu.memory_space<vmem>>, %arg5: memref<16x32xf32, #tpu.memory_space<vmem>>, %arg6: memref<16x32xf32, #tpu.memory_space<vmem>>, %arg7: memref<1x32xf32, #tpu.memory_space<vmem>>, %arg8: memref<1x32xf32, #tpu.memory_space<vmem>>, %arg9: memref<1xf32, #tpu.memory_space<smem>>, %arg10: memref<1x8xf32, #tpu.memory_space<vmem>>) attributes {dimension_semantics = [#tpu.dimension_semantics<parallel>], iteration_bounds = array<i64: 1>, scalar_prefetch = 0 : i64, scratch_operands = 0 : i64, tpu.core_type = #tpu.core_type<tc>, window_params = [{transform_indices = @transform_0, window_bounds = array<i64: 8, 32>}, {transform_indices = @transform_1, window_bounds = array<i64: 8, 16>}, {transform_indices = @transform_2, window_bounds = array<i64: 8, 16>}, {pipeline_mode = #tpu.pipeline_mode<synchronous>, transform_indices = @transform_3, window_bounds = array<i64: 32, 32>}, {pipeline_mode = #tpu.pipeline_mode<synchronous>, transform_indices = @transform_4, window_bounds = array<i64: 16, 32>}, {pipeline_mode = #tpu.pipeline_mode<synchronous>, transform_indices = @transform_5, window_bounds = array<i64: 16, 32>}, {pipeline_mode = #tpu.pipeline_mode<synchronous>, transform_indices = @transform_6, window_bounds = array<i64: 1, 32>}, {pipeline_mode = #tpu.pipeline_mode<synchronous>, transform_indices = @transform_7, window_bounds = array<i64: 1, 32>}, {transform_indices = @transform_8, window_bounds = array<i64: 1>}, {transform_indices = @transform_9, window_bounds = array<i64: 1, 8>}]} {
    %c0 = arith.constant 0 : index
    %c0_0 = arith.constant 0 : index
    %0 = vector.load %arg1[%c0, %c0_0] : memref<8x32xf32, #tpu.memory_space<vmem>>, vector<8x32xf32>
    %c0_1 = arith.constant 0 : index
    %c0_2 = arith.constant 0 : index
    %1 = vector.load %arg4[%c0_1, %c0_2] : memref<32x32xf32, #tpu.memory_space<vmem>>, vector<32x32xf32>
    %cst = arith.constant dense<0.000000e+00> : vector<8x32xf32>
    %2 = tpu.matmul %0, %1, %cst {dimension_numbers = #tpu.dot_dimension_numbers<[1], [0], [0], [1], [0, 0, 1, 1], [], []>} : vector<8x32xf32>, vector<32x32xf32>, vector<8x32xf32> -> vector<8x32xf32>
    %c0_3 = arith.constant 0 : index
    %c0_4 = arith.constant 0 : index
    %3 = vector.load %arg2[%c0_3, %c0_4] : memref<8x16xf32, #tpu.memory_space<vmem>>, vector<8x16xf32>
    %c0_5 = arith.constant 0 : index
    %c0_6 = arith.constant 0 : index
    %4 = vector.load %arg5[%c0_5, %c0_6] : memref<16x32xf32, #tpu.memory_space<vmem>>, vector<16x32xf32>
    %cst_7 = arith.constant dense<0.000000e+00> : vector<8x32xf32>
    %5 = tpu.matmul %3, %4, %cst_7 {dimension_numbers = #tpu.dot_dimension_numbers<[1], [0], [0], [1], [0, 0, 1, 1], [], []>} : vector<8x16xf32>, vector<16x32xf32>, vector<8x32xf32> -> vector<8x32xf32>
    %6 = arith.addf %2, %5 : vector<8x32xf32>
    %c0_8 = arith.constant 0 : index
    %c0_9 = arith.constant 0 : index
    %7 = vector.load %arg3[%c0_8, %c0_9] : memref<8x16xf32, #tpu.memory_space<vmem>>, vector<8x16xf32>
    %c0_10 = arith.constant 0 : index
    %c0_11 = arith.constant 0 : index
    %8 = vector.load %arg6[%c0_10, %c0_11] : memref<16x32xf32, #tpu.memory_space<vmem>>, vector<16x32xf32>
    %cst_12 = arith.constant dense<0.000000e+00> : vector<8x32xf32>
    %9 = tpu.matmul %7, %8, %cst_12 {dimension_numbers = #tpu.dot_dimension_numbers<[1], [0], [0], [1], [0, 0, 1, 1], [], []>} : vector<8x16xf32>, vector<16x32xf32>, vector<8x32xf32> -> vector<8x32xf32>
    %10 = arith.addf %6, %9 : vector<8x32xf32>
    %c0_13 = arith.constant 0 : index
    %c0_14 = arith.constant 0 : index
    %11 = vector.load %arg7[%c0_13, %c0_14] : memref<1x32xf32, #tpu.memory_space<vmem>>, vector<1x32xf32>
    %12 = vector.broadcast %11 : vector<1x32xf32> to vector<8x32xf32>
    %13 = arith.addf %10, %12 : vector<8x32xf32>
    %cst_15 = arith.constant 0.000000e+00 : f32
    %14 = vector.broadcast %cst_15 : f32 to vector<8x32xf32>
    %15 = arith.cmpf ogt, %13, %14 : vector<8x32xf32>
    %cst_16 = arith.constant 0.00999999977 : f32
    %16 = vector.broadcast %cst_16 : f32 to vector<8x32xf32>
    %17 = arith.mulf %16, %13 : vector<8x32xf32>
    %18 = arith.select %15, %13, %17 : vector<8x32xi1>, vector<8x32xf32>
    %c0_17 = arith.constant 0 : index
    %c0_18 = arith.constant 0 : index
    %19 = vector.load %arg8[%c0_17, %c0_18] : memref<1x32xf32, #tpu.memory_space<vmem>>, vector<1x32xf32>
    %cst_19 = arith.constant dense<0.000000e+00> : vector<1x8xf32>
    %20 = tpu.matmul %19, %18, %cst_19 {dimension_numbers = #tpu.dot_dimension_numbers<[1], [1], [0], [0], [0, 0, 1, 0], [], []>} : vector<1x32xf32>, vector<8x32xf32>, vector<1x8xf32> -> vector<1x8xf32>
    %c0_20 = arith.constant 0 : index
    %21 = memref.load %arg9[%c0_20] : memref<1xf32, #tpu.memory_space<smem>>
    %22 = vector.broadcast %21 : f32 to vector<1x8xf32>
    %23 = arith.addf %20, %22 : vector<1x8xf32>
    %c0_21 = arith.constant 0 : index
    %c0_22 = arith.constant 0 : index
    %24 = vector.load %arg10[%c0_21, %c0_22] : memref<1x8xf32, #tpu.memory_space<vmem>>, vector<1x8xf32>
    tpu.vector_store %arg10[%c0_21, %c0_22], %23 {strides = array<i32>} : memref<1x8xf32, #tpu.memory_space<vmem>>, vector<1x8xf32>,
    return
  }
  func.func @transform_0(%arg0: i32) -> (i32, i32) {
    %c0_i32 = arith.constant 0 : i32
    %c0_i32_0 = arith.constant 0 : i32
    return %arg0, %c0_i32 : i32, i32
  }
  func.func @transform_1(%arg0: i32) -> (i32, i32) {
    %c0_i32 = arith.constant 0 : i32
    %c0_i32_0 = arith.constant 0 : i32
    return %arg0, %c0_i32 : i32, i32
  }
  func.func @transform_2(%arg0: i32) -> (i32, i32) {
    %c0_i32 = arith.constant 0 : i32
    %c0_i32_0 = arith.constant 0 : i32
    return %arg0, %c0_i32 : i32, i32
  }
  func.func @transform_3(%arg0: i32) -> (i32, i32) {
    %c0_i32 = arith.constant 0 : i32
    %c0_i32_0 = arith.constant 0 : i32
    %c0_i32_1 = arith.constant 0 : i32
    return %c0_i32, %c0_i32_0 : i32, i32
  }
  func.func @transform_4(%arg0: i32) -> (i32, i32) {
    %c0_i32 = arith.constant 0 : i32
    %c0_i32_0 = arith.constant 0 : i32
    %c0_i32_1 = arith.constant 0 : i32
    return %c0_i32, %c0_i32_0 : i32, i32
  }
  func.func @transform_5(%arg0: i32) -> (i32, i32) {
    %c0_i32 = arith.constant 0 : i32
    %c0_i32_0 = arith.constant 0 : i32
    %c0_i32_1 = arith.constant 0 : i32
    return %c0_i32, %c0_i32_0 : i32, i32
  }
  func.func @transform_6(%arg0: i32) -> (i32, i32) {
    %c0_i32 = arith.constant 0 : i32
    %c0_i32_0 = arith.constant 0 : i32
    %c0_i32_1 = arith.constant 0 : i32
    return %c0_i32, %c0_i32_0 : i32, i32
  }
  func.func @transform_7(%arg0: i32) -> (i32, i32) {
    %c0_i32 = arith.constant 0 : i32
    %c0_i32_0 = arith.constant 0 : i32
    %c0_i32_1 = arith.constant 0 : i32
    return %c0_i32, %c0_i32_0 : i32, i32
  }
  func.func @transform_8(%arg0: i32) -> i32 {
    %c0_i32 = arith.constant 0 : i32
    %c0_i32_0 = arith.constant 0 : i32
    return %c0_i32 : i32
  }
  func.func @transform_9(%arg0: i32) -> (i32, i32) {
    %c0_i32 = arith.constant 0 : i32
    %c0_i32_0 = arith.constant 0 : i32
    return %c0_i32, %arg0 : i32, i32
  }
}

</mosaic_0001>

<bundles_post_ra>
// kernel: trajscore_forward.1
= control target key start
LH: loop header
LB: loop body
LE: loop exit
PB: predicated region body
PF: predicated region fallthrough
CT: control target
= control target key end

     0   :  { %vm42_vm0 = vcmask 130048   ;;  %s301_s0 = inlined_call_operand.vmem [shape: f32[8,32], index: 0, kind: input, shape index: {}]   ;;  %s302_s1 = inlined_call_operand.vmem [shape: f32[8,16], index: 1, kind: input, shape index: {}]   ;;  %s303_s2 = inlined_call_operand.vmem [shape: f32[8,16], index: 2, kind: input, shape index: {}]   ;;  %s304_s3 = inlined_call_operand.vmem [shape: f32[32,32], index: 3, kind: input, shape index: {}]   ;;  %s305_s4 = inlined_call_operand.vmem [shape: f32[16,32], index: 4, kind: input, shape index: {}]   ;;  %s306_s5 = inlined_call_operand.vmem [shape: f32[16,32], index: 5, kind: input, shape index: {}]   ;;  %s307_s6 = inlined_call_operand.vmem [shape: f32[1,32], index: 6, kind: input, shape index: {}]   ;;  %s308_s7 = inlined_call_operand.vmem [shape: f32[1,32], index: 7, kind: input, shape index: {}]   ;;  %s309_s8 = inlined_call_operand.<no memory space> [shape: f32[1], index: 8, kind: input, shape index: {}]   ;;  %s310_s9 = inlined_call_operand.hbm [shape: f32[1,8], index: 9, kind: output, shape index: {}]  }
   0x1   :  { %v38_v0 = vld [vmem:[%s304_s3 + $0x18] sm:$0xff]  ;;  %v92_v1 = vld [vmem:[%s306_s5 + $0x8] sm:$0xff]  ;;  %v37_v2 = vld [vmem:[%s304_s3 + $0x10] sm:$0xff] }
   0x2   :  { %82 = vmatpush.msra.mxu1 %v38_v0  ;;  %110 = vmatpush.msra.mxu2 %v92_v1  ;;  %v91_v3 = vld [vmem:[%s306_s5] sm:$0xff]  ;;  %v41_v5 = vld [vmem:[%s305_s4 + $0x8] sm:$0xff] }
   0x3   :  { %v90_v4 = vld [vmem:[%s303_s2] sm:$0xff]  ;;  %60 = vmatpush.msra.mxu0 %v41_v5  ;;  %v36_v6 = vld [vmem:[%s304_s3 + $0x8] sm:$0xff] }
   0x4   :  { %v40_v7 = vld [vmem:[%s305_s4] sm:$0xff]  ;;  %83 = vmatpush.msra.mxu1 %v37_v2  ;;  %111 = vmatpush.msra.mxu2 %v91_v3 }
   0x5   :  { %v39_v8 = vld [vmem:[%s302_s1] sm:$0xff]  ;;  %174 = vmatmul.msk.f32.vlgmr.msra.gmra.mxu2 %vm42_vm0, %v90_v4  ;;  %61 = vmatpush.msra.mxu0 %v40_v7 }
   0x6   :  { %v35_v9 = vld [vmem:[%s304_s3] sm:$0xff] }
   0x7   :  { %15 = vsyncpa [#allocation4], 0  ;;  %84 = vmatpush.msra.mxu1 %v36_v6  ;;  %172 = vmatmul.msk.f32.vlgmr.msra.gmra.mxu0 %vm42_vm0, %v39_v8  ;;  %v34_v10 = vld [vmem:[%s301_s0] sm:$0xff]  ;;  %vm66_vm1 = vcmask 261120   ;;  %v127_v21 = vstv %s309_s8  ;;  %s205_s10 = smov [#allocation3]   ;;  %s163_s13 = sshll.u32 %s310_s9, 4  ;;  %s164_s13 = int_to_ptr.hbm [resolvable:$true] %s163_s13 }
   0x8   :  { %v178_v14 = vld [vmem:[%s307_s6] ss:$0 sm:$0xff]  ;;  %s161_s11 = sshll.u32 %s205_s10, 4  ;;  %vm154_vm3 = vcmask 57344   ;;  %s162_s11 = int_to_ptr.vmem [resolvable:$true] %s161_s11 }
   0x9   :  { %85 = vmatpush.msra.mxu1 %v35_v9  ;;  %v125_v20 = vld [vmem:[%s308_s7] sm:$0x1] }
   0xa   :  { %173 = vmatmul.msk.f32.vlgmr.msra.gmra.mxu1 %vm66_vm1, %v34_v10 }
  0x84   :  { %v63_v11 = vpop.f32.mrf.mxu0 }
  0x87   :  { %v87_v12 = vpop.f32.mrf.mxu1 }
  0x88   :  { %v88_v13 = vadd.f32 %v87_v12, %v63_v11  ;;  %v113_v15 = vpop.f32.mrf.mxu2 }
  0x8a   :  { %v116_v16 = vadd.f32 %v113_v15, %v88_v13 }
  0x8c   :  { %v121_v17 = vadd.f32 %v178_v14, %v116_v16 }
  0x8e   :  { %vm122_vm2 = vcmp.gt.f32.partialorder %v121_v17, 0.0  ;;  %v123_v18 = vmul.f32 0.01, %v121_v17 }
  0x90   :  { %v124_v19 = vsel %vm122_vm2, %v121_v17, %v123_v18 }
  0x91   :  { %175 = vmatpush.xpose.msk.msra.mxu3 %vm66_vm1, %v124_v19 }
  0x94   :  { %176 = vmatmul.msk.f32.vlgmr.msra.gmra.mxu3 %vm66_vm1, %v125_v20 }
 0x117   :  { %v151_v22 = vpop.f32.mrf.mxu3 }
 0x118   :  { %v152_v23 = vadd.f32 %v151_v22, %v127_v21 }
 0x11a   :  { %155 = vst.msk [vmem:[#allocation3] sm:$0x1] %vm154_vm3, %v152_v23 }
 0x11b   :  { %166 = dma.vmem_to_hbm [thread:$0]  %s162_s11, 16, %s164_s13, [#allocation4]  }
 0x11c   :  { %203 = dma.done.wait [#allocation4], 16  }
 0x11d   :  { %204 = vsyncadd [#allocation4], 4294967280 }
 0x11e   :  { %171 = vsyncpa [#allocation4], 1 }

</bundles_post_ra>
